<compile_context>
chip_gen: v7x
topology: tpu7x:2x2x1
jax: 0.10.0
libtpu: 0.0.40
codegen_flags: <defaults>
</compile_context>

<pallas_src>
import jax
import jax.numpy as jnp
from jax.experimental import pallas as pl
from jax.experimental.pallas import tpu as pltpu

# ---- small, module-consistent shapes (scaled-down VGG19 classifier head) ----
B         = 2            # batch
C, H, W   = 8, 8, 8      # NCHW feature map -> D_IN = C*H*W
D_IN      = C * H * W    # 512   (stands in for 25088 = 512*7*7)
HIDDEN    = 256          # stands in for --hidden_units (default 4096)
D_MID     = 128          # stands in for 2048
D_OUT     = 102          # 102 flower classes (kept exact, semantics unchanged)

B_PAD     = 8            # sublane-aligned batch  (vreg = 8 x 128)
D_OUT_PAD = 128          # lane-aligned class dim
NEG_BIG   = -1e30        # plain Python float: padded-class bias, exp() underflows to 0


def classifier_kernel(x_ref, w1_ref, b1_ref, w2_ref, b2_ref, w3_ref, b3_ref, out_ref):
    """Fused MLP head: all operands resident in VMEM (single grid point).

    x and weights arrive in bf16 (MXU inputs), biases in f32; all accumulation
    and elementwise math is f32.  Padded class lanes carry logits of -1e30
    straight from the (zero w3 column + -1e30 bias) prep, so no mask is needed.
    """
    # hoisted bias reads (broadcast once)
    b1 = b1_ref[...]
    b2 = b2_ref[...]
    b3 = b3_ref[...]

    # fc1 + ReLU   (dropout = identity, inference mode)
    h1 = jnp.dot(x_ref[...], w1_ref[...],
                 preferred_element_type=jnp.float32) + b1
    h1 = jnp.maximum(h1, 0.0)

    # fc2 + ReLU   (dropout = identity, inference mode)
    h2 = jnp.dot(h1.astype(jnp.bfloat16), w2_ref[...],
                 preferred_element_type=jnp.float32) + b2
    h2 = jnp.maximum(h2, 0.0)

    # fc3  (class dim padded to 128 lanes; padded lanes become -1e30 via b3)
    logits = jnp.dot(h2.astype(jnp.bfloat16), w3_ref[...],
                     preferred_element_type=jnp.float32) + b3   # (B_PAD, 128)

    # log_softmax over dim=1 (classes), numerically stable
    m   = jnp.max(logits, axis=-1, keepdims=True)
    z   = logits - m
    lse = jnp.log(jnp.sum(jnp.exp(z), axis=-1, keepdims=True))
    out_ref[...] = z - lse


def prepare_params(params):
    """One-time layout/dtype prep of the stored parameters (NOT per forward):
    bf16 weights for the MXU, class dim of fc3 padded to 128 lanes with
    zero weight columns and -1e30 bias lanes (mask-free padded-class handling)."""
    w1, b1, w2, b2, w3, b3 = params
    w1b = w1.astype(jnp.bfloat16)
    w2b = w2.astype(jnp.bfloat16)
    w3b = jnp.pad(w3, ((0, 0), (0, D_OUT_PAD - D_OUT))).astype(jnp.bfloat16)
    b3p = jnp.pad(b3, ((0, 0), (0, D_OUT_PAD - D_OUT)), constant_values=NEG_BIG)
    return (w1b, b1.astype(jnp.float32), w2b, b2.astype(jnp.float32), w3b,
            b3p.astype(jnp.float32))


def classifier_forward(x_nchw, prepared):
    """x_nchw: (B, C, H, W). Returns (B, D_OUT) log-probabilities."""
    w1b, b1, w2b, b2, w3b, b3p = prepared
    b = x_nchw.shape[0]
    # x.view(x.shape[0], -1); fed to the MXU in bf16, padded to 8 sublane rows
    x2d_p = jnp.pad(x_nchw.reshape(b, -1).astype(jnp.bfloat16),
                    ((0, B_PAD - b), (0, 0)))                   # (8, D_IN) bf16

    # advisory cost estimate for XLA's scheduler
    flops = 2 * B_PAD * (D_IN * HIDDEN + HIDDEN * D_MID + D_MID * D_OUT_PAD)
    bytes_accessed = (
        x2d_p.size * 2                                          # input bf16
        + (w1b.size + w2b.size + w3b.size) * 2                  # weights bf16
        + (b1.size + b2.size + b3p.size) * 4                    # biases f32
        + B_PAD * D_OUT_PAD * 4                                 # output f32
    )
    cost = pl.CostEstimate(flops=flops,
                           transcendentals=B_PAD * D_OUT_PAD,   # exp/log in softmax
                           bytes_accessed=bytes_accessed)

    vmem = pl.BlockSpec(memory_space=pltpu.MemorySpace.VMEM)
    out_p = pl.pallas_call(
        classifier_kernel,
        out_shape=jax.ShapeDtypeStruct((B_PAD, D_OUT_PAD), jnp.float32),
        in_specs=[vmem] * 7,
        out_specs=vmem,
        cost_estimate=cost,
    )(x2d_p, w1b, b1, w2b, b2, w3b, b3p)

    return out_p[:b, :D_OUT]


def init_params(key):
    """Deterministic PyTorch-style init: U(-1/sqrt(fan_in), 1/sqrt(fan_in))."""
    def linear(k, fan_in, fan_out):
        kw, kb = jax.random.split(k)
        bound = 1.0 / jnp.sqrt(fan_in)
        w = jax.random.uniform(kw, (fan_in, fan_out), jnp.float32, -bound, bound)
        b = jax.random.uniform(kb, (1, fan_out), jnp.float32, -bound, bound)
        return w, b

    k1, k2, k3 = jax.random.split(key, 3)
    w1, b1 = linear(k1, D_IN, HIDDEN)
    w2, b2 = linear(k2, HIDDEN, D_MID)
    w3, b3 = linear(k3, D_MID, D_OUT)
    return (w1, b1, w2, b2, w3, b3)


def reference_forward_bf16(x_nchw, params):
    """Pure-JAX reference of the same compute path (bf16 MXU inputs, f32 accum)."""
    w1, b1, w2, b2, w3, b3 = params
    x = x_nchw.reshape(x_nchw.shape[0], -1).astype(jnp.bfloat16)
    h1 = jnp.maximum(jnp.dot(x, w1.astype(jnp.bfloat16),
                             preferred_element_type=jnp.float32) + b1, 0.0)
    h2 = jnp.maximum(jnp.dot(h1.astype(jnp.bfloat16), w2.astype(jnp.bfloat16),
                             preferred_element_type=jnp.float32) + b2, 0.0)
    logits = jnp.dot(h2.astype(jnp.bfloat16), w3.astype(jnp.bfloat16),
                     preferred_element_type=jnp.float32) + b3
    return jax.nn.log_softmax(logits, axis=1)


def reference_forward_f32(x_nchw, params):
    """Full-precision reference (sanity check for the bf16 weight quantization)."""
    w1, b1, w2, b2, w3, b3 = params
    x = x_nchw.reshape(x_nchw.shape[0], -1)
    x = jnp.maximum(x @ w1 + b1, 0.0)
    x = jnp.maximum(x @ w2 + b2, 0.0)
    logits = x @ w3 + b3
    return jax.nn.log_softmax(logits, axis=1)


if __name__ == "__main__":
    key = jax.random.PRNGKey(0)
    kx, kp = jax.random.split(key)

    x = jax.random.normal(kx, (B, C, H, W), jnp.float32)      # NCHW, like PyTorch
    params = init_params(kp)
    prepared = jax.block_until_ready(prepare_params(params))  # one-time weight prep

    out = classifier_forward(x, prepared)
    out = jax.block_until_ready(out)
    assert out.shape == (B, D_OUT)

    ref_bf16 = reference_forward_bf16(x, params)
    assert jnp.allclose(out, ref_bf16, atol=1e-3, rtol=1e-3), \
        "mismatch vs bf16-path JAX reference"

    ref_f32 = reference_forward_f32(x, params)
    assert jnp.allclose(out, ref_f32, atol=5e-2, rtol=5e-2), \
        "mismatch vs f32 JAX reference beyond bf16 quantization tolerance"

    print("KERNEL_OK")
</pallas_src>

<mosaic_0001>
module attributes {stable_mosaic.version = 11 : i64} {
  func.func @classifier_kernel(%arg0: memref<8x512xbf16, #tpu.memory_space<vmem>>, %arg1: memref<512x256xbf16, #tpu.memory_space<vmem>>, %arg2: memref<1x256xf32, #tpu.memory_space<vmem>>, %arg3: memref<256x128xbf16, #tpu.memory_space<vmem>>, %arg4: memref<1x128xf32, #tpu.memory_space<vmem>>, %arg5: memref<128x128xbf16, #tpu.memory_space<vmem>>, %arg6: memref<1x128xf32, #tpu.memory_space<vmem>>, %arg7: memref<8x128xf32, #tpu.memory_space<vmem>>) attributes {dimension_semantics = [], scalar_prefetch = 0 : i64, scratch_operands = 0 : i64, tpu.core_type = #tpu.core_type<tc>} {
    %c0 = arith.constant 0 : index
    %c0_0 = arith.constant 0 : index
    %0 = vector.load %arg2[%c0, %c0_0] : memref<1x256xf32, #tpu.memory_space<vmem>>, vector<1x256xf32>
    %c0_1 = arith.constant 0 : index
    %c0_2 = arith.constant 0 : index
    %1 = vector.load %arg4[%c0_1, %c0_2] : memref<1x128xf32, #tpu.memory_space<vmem>>, vector<1x128xf32>
    %c0_3 = arith.constant 0 : index
    %c0_4 = arith.constant 0 : index
    %2 = vector.load %arg6[%c0_3, %c0_4] : memref<1x128xf32, #tpu.memory_space<vmem>>, vector<1x128xf32>
    %c0_5 = arith.constant 0 : index
    %c0_6 = arith.constant 0 : index
    %3 = vector.load %arg0[%c0_5, %c0_6] : memref<8x512xbf16, #tpu.memory_space<vmem>>, vector<8x512xbf16>
    %c0_7 = arith.constant 0 : index
    %c0_8 = arith.constant 0 : index
    %4 = vector.load %arg1[%c0_7, %c0_8] : memref<512x256xbf16, #tpu.memory_space<vmem>>, vector<512x256xbf16>
    %cst = arith.constant dense<0.000000e+00> : vector<8x256xf32>
    %5 = tpu.matmul %3, %4, %cst {dimension_numbers = #tpu.dot_dimension_numbers<[1], [0], [0], [1], [0, 0, 1, 1], [], []>} : vector<8x512xbf16>, vector<512x256xbf16>, vector<8x256xf32> -> vector<8x256xf32>
    %6 = vector.broadcast %0 : vector<1x256xf32> to vector<8x256xf32>
    %7 = arith.addf %5, %6 : vector<8x256xf32>
    %cst_9 = arith.constant 0.000000e+00 : f32
    %8 = vector.broadcast %cst_9 : f32 to vector<8x256xf32>
    %9 = arith.maximumf %7, %8 : vector<8x256xf32>
    %10 = arith.truncf %9 : vector<8x256xf32> to vector<8x256xbf16>
    %c0_10 = arith.constant 0 : index
    %c0_11 = arith.constant 0 : index
    %11 = vector.load %arg3[%c0_10, %c0_11] : memref<256x128xbf16, #tpu.memory_space<vmem>>, vector<256x128xbf16>
    %cst_12 = arith.constant dense<0.000000e+00> : vector<8x128xf32>
    %12 = tpu.matmul %10, %11, %cst_12 {dimension_numbers = #tpu.dot_dimension_numbers<[1], [0], [0], [1], [0, 0, 1, 1], [], []>} : vector<8x256xbf16>, vector<256x128xbf16>, vector<8x128xf32> -> vector<8x128xf32>
    %13 = vector.broadcast %1 : vector<1x128xf32> to vector<8x128xf32>
    %14 = arith.addf %12, %13 : vector<8x128xf32>
    %cst_13 = arith.constant 0.000000e+00 : f32
    %15 = vector.broadcast %cst_13 : f32 to vector<8x128xf32>
    %16 = arith.maximumf %14, %15 : vector<8x128xf32>
    %17 = arith.truncf %16 : vector<8x128xf32> to vector<8x128xbf16>
    %c0_14 = arith.constant 0 : index
    %c0_15 = arith.constant 0 : index
    %18 = vector.load %arg5[%c0_14, %c0_15] : memref<128x128xbf16, #tpu.memory_space<vmem>>, vector<128x128xbf16>
    %cst_16 = arith.constant dense<0.000000e+00> : vector<8x128xf32>
    %19 = tpu.matmul %17, %18, %cst_16 {dimension_numbers = #tpu.dot_dimension_numbers<[1], [0], [0], [1], [0, 0, 1, 1], [], []>} : vector<8x128xbf16>, vector<128x128xbf16>, vector<8x128xf32> -> vector<8x128xf32>
    %20 = vector.broadcast %2 : vector<1x128xf32> to vector<8x128xf32>
    %21 = arith.addf %19, %20 : vector<8x128xf32>
    %cst_17 = arith.constant dense<0xFF800000> : vector<8xf32>
    %22 = vector.multi_reduction <maximumf>, %21, %cst_17 [1] : vector<8x128xf32> to vector<8xf32>
    %23 = vector.shape_cast %22 : vector<8xf32> to vector<8x1xf32>
    %24 = vector.broadcast %23 : vector<8x1xf32> to vector<8x128xf32>
    %25 = arith.subf %21, %24 : vector<8x128xf32>
    %26 = math.exp %25 : vector<8x128xf32>
    %cst_18 = arith.constant dense<0.000000e+00> : vector<8xf32>
    %27 = vector.multi_reduction <add>, %26, %cst_18 [1] : vector<8x128xf32> to vector<8xf32>
    %28 = vector.shape_cast %27 : vector<8xf32> to vector<8x1xf32>
    %29 = math.log %28 : vector<8x1xf32>
    %30 = vector.broadcast %29 : vector<8x1xf32> to vector<8x128xf32>
    %31 = arith.subf %25, %30 : vector<8x128xf32>
    %c0_19 = arith.constant 0 : index
    %c0_20 = arith.constant 0 : index
    %32 = vector.load %arg7[%c0_19, %c0_20] : memref<8x128xf32, #tpu.memory_space<vmem>>, vector<8x128xf32>
    tpu.vector_store %arg7[%c0_19, %c0_20], %31 {strides = array<i32>} : memref<8x128xf32, #tpu.memory_space<vmem>>, vector<8x128xf32>,
    return
  }
}

</mosaic_0001>

<bundles_post_ra>
// kernel: tpu_custom_call.1
= control target key start
LH: loop header
LB: loop body
LE: loop exit
PB: predicated region body
PF: predicated region fallthrough
CT: control target
= control target key end

     0   :  { %12 = vsyncpa [#allocation3], 0  ;;  %s1435_s0 = inlined_call_operand.hbm [shape: bf16[8,512], index: 0, kind: input, shape index: {}]   ;;  %s1436_s1 = inlined_call_operand.hbm [shape: bf16[512,256], index: 1, kind: input, shape index: {}]   ;;  %s1437_s2 = inlined_call_operand.vmem [shape: f32[1,256], index: 2, kind: input, shape index: {}]   ;;  %s1438_s3 = inlined_call_operand.hbm [shape: bf16[256,128], index: 3, kind: input, shape index: {}]   ;;  %s1439_s4 = inlined_call_operand.vmem [shape: f32[1,128], index: 4, kind: input, shape index: {}]   ;;  %s1440_s5 = inlined_call_operand.hbm [shape: bf16[128,128], index: 5, kind: input, shape index: {}]   ;;  %s1441_s6 = inlined_call_operand.vmem [shape: f32[1,128], index: 6, kind: input, shape index: {}]   ;;  %s1442_s7 = inlined_call_operand.hbm [shape: f32[8,128], index: 7, kind: output, shape index: {}]  }
   0x1   :  { %13 = vsyncpa [#allocation6], 0 }
   0x2   :  { %14 = vsyncpa [#allocation9], 0 }
   0x3   :  { %15 = vsyncpa [#allocation4], 0  ;;  %s1303_s24 = smov [#allocation5]   ;;  %s1185_s28 = scalar_lea.hbm %s1436_s1, 8192 }
   0x4   :  { %s31_s25 = sshll.u32 %s1303_s24, 4  ;;  %p1186_p0 = scmp.ne.s32.totalorder %s1436_s1, %s1185_s28  ;;  %s32_s25 = int_to_ptr.vmem [resolvable:$true] %s31_s25 }
   0x5   :  { %p1189_p1 = scmp.lt.u32.totalorder %s1185_s28, %s1436_s1 }
   0x7   :  { %p1191_p2 = pnand %p1189_p1, %p1186_p0 }
   0x9   :  { %1194 = shalt.err (!%p1191_p2)
}
   0xa   :  { %s1195_s10 = scalar_lea.vmem %s32_s25, 8192  ;;  %p1200_p4 = scmp.lt.s32.totalorder %s32_s25, %s32_s25 }
   0xb   :  { %p1196_p3 = scmp.ne.s32.totalorder %s32_s25, %s1195_s10  ;;  %p1201_p5 = scmp.lt.s32.totalorder %s1195_s10, %s1195_s10 }
   0xd   :  { %p1202_p6 = por %p1201_p5, %p1200_p4 }
   0xf   :  { %p1203_p7 = pnand %p1202_p6, %p1196_p3 }
  0x11   :  { %1206 = shalt.err (!%p1203_p7)
}
  0x12   :  { %s1304_s11 = smov 128   ;;  %s1305_s12 = smov 8  }
  0x13   :  { %37 = dma.hbm_to_vmem [thread:$0]  %s1436_s1, 8192, %s32_s25, [#allocation6], %s1304_s11, %s1304_s11, %s1305_s12  }
  0x14   :  { %s1306_s15 = smov [#allocation2]   ;;  %s1307_s17 = smov [#allocation7]  }
  0x15   :  { %s22_s16 = sshll.u32 %s1306_s15, 4  ;;  %s45_s18 = sshll.u32 %s1307_s17, 4  ;;  %s23_s16 = int_to_ptr.vmem [resolvable:$true] %s22_s16  ;;  %s46_s18 = int_to_ptr.vmem [resolvable:$true] %s45_s18 }
  0x16   :  { %s1207_s21 = scalar_lea.hbm %s1435_s0, 256 }
  0x17   :  { %p1208_p8 = scmp.ne.s32.totalorder %s1435_s0, %s1207_s21  ;;  %p1211_p9 = scmp.lt.u32.totalorder %s1207_s21, %s1435_s0 }
  0x19   :  { %p1213_p10 = pnand %p1211_p9, %p1208_p8 }
  0x1b   :  { %1216 = shalt.err (!%p1213_p10)
}
  0x1c   :  { %s1217_s1 = scalar_lea.vmem %s23_s16, 256  ;;  %p1222_p12 = scmp.lt.s32.totalorder %s23_s16, %s23_s16 }
  0x1d   :  { %p1218_p11 = scmp.ne.s32.totalorder %s23_s16, %s1217_s1  ;;  %p1223_p13 = scmp.lt.s32.totalorder %s1217_s1, %s1217_s1 }
  0x1f   :  { %p1224_p0 = por %p1223_p13, %p1222_p12 }
  0x21   :  { %p1225_p1 = pnand %p1224_p0, %p1218_p11 }
  0x23   :  { %1228 = shalt.err (!%p1225_p1)
}
  0x24   :  { %25 = dma.hbm_to_vmem [thread:$0]  %s1435_s0, 256, %s23_s16, [#allocation3]  }
  0x25   :  { %s1229_s30 = scalar_lea.hbm %s1438_s3, 2048 }
  0x26   :  { %p1230_p2 = scmp.ne.s32.totalorder %s1438_s3, %s1229_s30  ;;  %p1233_p3 = scmp.lt.u32.totalorder %s1229_s30, %s1438_s3 }
  0x28   :  { %p1235_p4 = pnand %p1233_p3, %p1230_p2 }
  0x2a   :  { %1238 = shalt.err (!%p1235_p4)
}
  0x2b   :  { %s1239_s12 = scalar_lea.vmem %s46_s18, 2048  ;;  %p1244_p6 = scmp.lt.s32.totalorder %s46_s18, %s46_s18 }
  0x2c   :  { %p1240_p5 = scmp.ne.s32.totalorder %s46_s18, %s1239_s12  ;;  %p1245_p7 = scmp.lt.s32.totalorder %s1239_s12, %s1239_s12 }
  0x2e   :  { %p1246_p8 = por %p1245_p7, %p1244_p6 }
  0x30   :  { %p1247_p9 = pnand %p1246_p8, %p1240_p5 }
  0x32   :  { %1250 = shalt.err (!%p1247_p9)
}
  0x33   :  { %s1308_s0 = smov 64   ;;  %s1309_s13 = smov 4  }
  0x34   :  { %51 = dma.hbm_to_vmem [thread:$0]  %s1438_s3, 2048, %s46_s18, [#allocation6], %s1308_s0, %s1308_s0, %s1309_s13  }
  0x35   :  { %s1310_s16 = smov [#allocation8]   ;;  %s1251_s21 = scalar_lea.hbm %s1440_s5, 1024 }
  0x36   :  { %s59_s17 = sshll.u32 %s1310_s16, 4  ;;  %p1252_p10 = scmp.ne.s32.totalorder %s1440_s5, %s1251_s21  ;;  %s60_s17 = int_to_ptr.vmem [resolvable:$true] %s59_s17 }
  0x37   :  { %p1255_p11 = scmp.lt.u32.totalorder %s1251_s21, %s1440_s5 }
  0x39   :  { %p1257_p12 = pnand %p1255_p11, %p1252_p10 }
  0x3b   :  { %1260 = shalt.err (!%p1257_p12)
}
  0x3c   :  { %s1261_s1 = scalar_lea.vmem %s60_s17, 1024  ;;  %p1266_p0 = scmp.lt.s32.totalorder %s60_s17, %s60_s17 }
  0x3d   :  { %p1262_p13 = scmp.ne.s32.totalorder %s60_s17, %s1261_s1  ;;  %p1267_p1 = scmp.lt.s32.totalorder %s1261_s1, %s1261_s1 }
  0x3f   :  { %p1268_p2 = por %p1267_p1, %p1266_p0 }
  0x41   :  { %p1269_p3 = pnand %p1268_p2, %p1262_p13 }
  0x43   :  { %1272 = shalt.err (!%p1269_p3)
}
  0x44   :  { %65 = dma.hbm_to_vmem [thread:$0]  %s1440_s5, 1024, %s60_s17, [#allocation9], %s1308_s0, %s1308_s0, %s1309_s13  }
  0x45   :  { %1295 = dma.done.wait [#allocation3], 256  }
  0x46   :  { %1296 = vsyncadd [#allocation3], 4294967040 }
  0x47   :  { %1297 = dma.done.wait [#allocation6], 10240  }
  0x48   :  { %1298 = vsyncadd [#allocation6], 4294957056 }
  0x49   :  { %1299 = dma.done.wait [#allocation9], 1024  }
  0x4a   :  { %1300 = vsyncadd [#allocation9], 4294966272  ;;  %v1057_v0 = vld [vmem:[#allocation5 + $0x4] ss:$8 sps:$4 sm:$0xff]   ;;  %v1059_v1 = vld [vmem:[#allocation5] ss:$8 sps:$4 sm:$0xff]  }
  0x4b   :  { %495 = vmatprep.subr.bf16.mxu0 %v1057_v0  ;;  %v1060_v2 = vld [vmem:[#allocation5 + $0x14] ss:$8 sps:$4 sm:$0xff]   ;;  %v1062_v3 = vld [vmem:[#allocation5 + $0x10] ss:$8 sps:$4 sm:$0xff]   ;;  %v1063_v4 = vld [vmem:[#allocation5 + $0x24] ss:$8 sps:$4 sm:$0xff]  }
  0x4c   :  { %496 = vmatpush1.bf16.msra.mxu0 %v1059_v1  ;;  %v1065_v5 = vld [vmem:[#allocation5 + $0x20] ss:$8 sps:$4 sm:$0xff]   ;;  %v1066_v6 = vld [vmem:[#allocation5 + $0x34] ss:$8 sps:$4 sm:$0xff]   ;;  %v1068_v7 = vld [vmem:[#allocation5 + $0x30] ss:$8 sps:$4 sm:$0xff]  }
  0x4d   :  { %497 = vmatprep.subr.bf16.mxu0 %v1060_v2  ;;  %v1069_v8 = vld [vmem:[#allocation5 + $0x44] ss:$8 sps:$4 sm:$0xff]   ;;  %v1071_v9 = vld [vmem:[#allocation5 + $0x40] ss:$8 sps:$4 sm:$0xff]   ;;  %v1072_v10 = vld [vmem:[#allocation5 + $0x54] ss:$8 sps:$4 sm:$0xff]  }
  0x4e   :  { %v1074_v11 = vld [vmem:[#allocation5 + $0x50] ss:$8 sps:$4 sm:$0xff]   ;;  %v1075_v12 = vld [vmem:[#allocation5 + $0x64] ss:$8 sps:$4 sm:$0xff]   ;;  %v1077_v15 = vld [vmem:[#allocation5 + $0x60] ss:$8 sps:$4 sm:$0xff]  }
  0x4f   :  { %v1402_v13 = vld [vmem:[#allocation2] sm:$0xff]  ;;  %v1081_v18 = vld [vmem:[#allocation5 + $0x84] ss:$8 sps:$4 sm:$0xff]   ;;  %v1083_v19 = vld [vmem:[#allocation5 + $0x80] ss:$8 sps:$4 sm:$0xff]   ;;  %vm1312_vm0 = vmmov 0  }
  0x50   :  { %498 = vmatpush1.bf16.msra.mxu0 %v1062_v3  ;;  %v896_v14 = vcombine.high %v1402_v13, %v1402_v13  ;;  %v1078_v16 = vld [vmem:[#allocation5 + $0x74] ss:$8 sps:$4 sm:$0xff]   ;;  %v1080_v17 = vld [vmem:[#allocation5 + $0x70] ss:$8 sps:$4 sm:$0xff]   ;;  %v1087_v22 = vld [vmem:[#allocation5 + $0xa4] ss:$8 sps:$4 sm:$0xff]   ;;  %v895_v47 = vcombine.low %v1402_v13, %v1402_v13 }
  0x51   :  { %499 = vmatprep.subr.bf16.mxu0 %v1063_v4  ;;  %v1084_v20 = vld [vmem:[#allocation5 + $0x94] ss:$8 sps:$4 sm:$0xff]   ;;  %v1086_v21 = vld [vmem:[#allocation5 + $0x90] ss:$8 sps:$4 sm:$0xff]   ;;  %v1089_v23 = vld [vmem:[#allocation5 + $0xa0] ss:$8 sps:$4 sm:$0xff]  }
  0x52   :  { %527 = vmatprep.mubr.bf16.mxu0 %v896_v14  ;;  %v1090_v24 = vld [vmem:[#allocation5 + $0xb4] ss:$8 sps:$4 sm:$0xff]   ;;  %v1092_v25 = vld [vmem:[#allocation5 + $0xb0] ss:$8 sps:$4 sm:$0xff]   ;;  %v1093_v26 = vld [vmem:[#allocation5 + $0xc4] ss:$8 sps:$4 sm:$0xff]  }
  0x53   :  { %v1157_v27 = vld [vmem:[#allocation7 + $0x40] sm:$0xff]   ;;  %v1096_v30 = vld [vmem:[#allocation5 + $0xd4] ss:$8 sps:$4 sm:$0xff]   ;;  %v1159_v31 = vld [vmem:[#allocation7 + $0x48] sm:$0xff]  }
  0x54   :  { %500 = vmatpush1.bf16.msra.mxu0 %v1065_v5  ;;  %v1095_v28 = vld [vmem:[#allocation5 + $0xc0] ss:$8 sps:$4 sm:$0xff]   ;;  %989 = vmatprep.subr.bf16.mxu1 %v1157_v27  ;;  %v1161_v33 = vld [vmem:[#allocation7 + $0x50] sm:$0xff]   ;;  %v1099_v35 = vld [vmem:[#allocation5 + $0xe4] ss:$8 sps:$4 sm:$0xff]  }
  0x55   :  { %501 = vmatprep.subr.bf16.mxu0 %v1066_v6  ;;  %v1158_v29 = vld [vmem:[#allocation7] sm:$0xff]   ;;  %v1160_v32 = vld [vmem:[#allocation7 + $0x8] sm:$0xff]   ;;  %v1098_v34 = vld [vmem:[#allocation5 + $0xd0] ss:$8 sps:$4 sm:$0xff]  }
  0x56   :  { %990 = vmatpush3.bf16.msra.mxu1 %v1158_v29  ;;  %v1162_v36 = vld [vmem:[#allocation7 + $0x10] sm:$0xff]   ;;  %v1163_v37 = vld [vmem:[#allocation7 + $0x58] sm:$0xff]   ;;  %v1101_v38 = vld [vmem:[#allocation5 + $0xe0] ss:$8 sps:$4 sm:$0xff]  }
  0x57   :  { %991 = vmatprep.subr.bf16.mxu1 %v1159_v31  ;;  %v1102_v39 = vld [vmem:[#allocation5 + $0xf4] ss:$8 sps:$4 sm:$0xff]   ;;  %v1165_v41 = vld [vmem:[#allocation7 + $0x60] sm:$0xff]   ;;  %v1104_v42 = vld [vmem:[#allocation5 + $0xf0] ss:$8 sps:$4 sm:$0xff]  }
  0x58   :  { %502 = vmatpush1.bf16.msra.mxu0 %v1068_v7  ;;  %v1164_v40 = vld [vmem:[#allocation7 + $0x18] sm:$0xff]   ;;  %v1166_v43 = vld [vmem:[#allocation7 + $0x20] sm:$0xff]   ;;  %v1167_v46 = vld [vmem:[#allocation7 + $0x68] sm:$0xff]  }
  0x59   :  { %503 = vmatprep.subr.bf16.mxu0 %v1069_v8  ;;  %v1109_v44 = vld [vmem:[#allocation5 + $0x104] ss:$8 sps:$4 sm:$0xff]   ;;  %v1406_v45 = vld [vmem:[#allocation2 + $0x8] sm:$0xff]  ;;  %v1107_v48 = vld [vmem:[#allocation5 + $0x100] ss:$8 sps:$4 sm:$0xff]  }
  0x5a   :  { %992 = vmatpush3.bf16.msra.mxu1 %v1160_v32  ;;  %v898_v49 = vcombine.high %v1406_v45, %v1406_v45  ;;  %v1112_v50 = vld [vmem:[#allocation5 + $0x114] ss:$8 sps:$4 sm:$0xff]   ;;  %v1168_v51 = vld [vmem:[#allocation7 + $0x28] sm:$0xff]   ;;  %v1110_v52 = vld [vmem:[#allocation5 + $0x110] ss:$8 sps:$4 sm:$0xff]  }
  0x5b   :  { %993 = vmatprep.subr.bf16.mxu1 %v1161_v33  ;;  %v1115_v53 = vld [vmem:[#allocation5 + $0x124] ss:$8 sps:$4 sm:$0xff]   ;;  %v1113_v54 = vld [vmem:[#allocation5 + $0x120] ss:$8 sps:$4 sm:$0xff]   ;;  %v1118_v55 = vld [vmem:[#allocation5 + $0x134] ss:$8 sps:$4 sm:$0xff]  }
  0x5c   :  { %504 = vmatpush1.bf16.msra.mxu0 %v1071_v9  ;;  %v1116_v56 = vld [vmem:[#allocation5 + $0x130] ss:$8 sps:$4 sm:$0xff]   ;;  %v1121_v57 = vld [vmem:[#allocation5 + $0x144] ss:$8 sps:$4 sm:$0xff]   ;;  %v1119_v58 = vld [vmem:[#allocation5 + $0x140] ss:$8 sps:$4 sm:$0xff]  }
  0x5d   :  { %505 = vmatprep.subr.bf16.mxu0 %v1072_v10  ;;  %v1124_v59 = vld [vmem:[#allocation5 + $0x154] ss:$8 sps:$4 sm:$0xff]   ;;  %v1122_v60 = vld [vmem:[#allocation5 + $0x150] ss:$8 sps:$4 sm:$0xff]   ;;  %v1127_v61 = vld [vmem:[#allocation5 + $0x164] ss:$8 sps:$4 sm:$0xff]  }
  0x5e   :  { %994 = vmatpush3.bf16.msra.mxu1 %v1162_v36  ;;  %v1125_v62 = vld [vmem:[#allocation5 + $0x160] ss:$8 sps:$4 sm:$0xff]   ;;  %v1130_v63 = vld [vmem:[#allocation5 + $0x174] ss:$8 sps:$4 sm:$0xff]   ;;  %v1128_v0 = vld [vmem:[#allocation5 + $0x170] ss:$8 sps:$4 sm:$0xff]  }
  0x5f   :  { %995 = vmatprep.subr.bf16.mxu1 %v1163_v37  ;;  %v1133_v1 = vld [vmem:[#allocation5 + $0x184] ss:$8 sps:$4 sm:$0xff]   ;;  %v1131_v2 = vld [vmem:[#allocation5 + $0x180] ss:$8 sps:$4 sm:$0xff]   ;;  %v1136_v3 = vld [vmem:[#allocation5 + $0x194] ss:$8 sps:$4 sm:$0xff]  }
  0x60   :  { %506 = vmatpush1.bf16.msra.mxu0 %v1074_v11  ;;  %v1134_v4 = vld [vmem:[#allocation5 + $0x190] ss:$8 sps:$4 sm:$0xff]   ;;  %v1139_v5 = vld [vmem:[#allocation5 + $0x1a4] ss:$8 sps:$4 sm:$0xff]   ;;  %v1137_v6 = vld [vmem:[#allocation5 + $0x1a0] ss:$8 sps:$4 sm:$0xff]  }
  0x61   :  { %507 = vmatprep.subr.bf16.mxu0 %v1075_v12  ;;  %v1142_v7 = vld [vmem:[#allocation5 + $0x1b4] ss:$8 sps:$4 sm:$0xff]   ;;  %v1140_v8 = vld [vmem:[#allocation5 + $0x1b0] ss:$8 sps:$4 sm:$0xff]   ;;  %v1145_v9 = vld [vmem:[#allocation5 + $0x1c4] ss:$8 sps:$4 sm:$0xff]  }
  0x62   :  { %996 = vmatpush3.bf16.msra.mxu1 %v1164_v40  ;;  %v1143_v10 = vld [vmem:[#allocation5 + $0x1c0] ss:$8 sps:$4 sm:$0xff]   ;;  %v1148_v11 = vld [vmem:[#allocation5 + $0x1d4] ss:$8 sps:$4 sm:$0xff]   ;;  %v1146_v12 = vld [vmem:[#allocation5 + $0x1d0] ss:$8 sps:$4 sm:$0xff]  }
  0x63   :  { %997 = vmatprep.subr.bf16.mxu1 %v1165_v41  ;;  %v1151_v13 = vld [vmem:[#allocation5 + $0x1e4] ss:$8 sps:$4 sm:$0xff]   ;;  %v1149_v14 = vld [vmem:[#allocation5 + $0x1e0] ss:$8 sps:$4 sm:$0xff]  }
  0x64   :  { %508 = vmatpush1.bf16.msra.mxu0 %v1077_v15  ;;  %v1154_v15 = vld [vmem:[#allocation5 + $0x1f4] ss:$8 sps:$4 sm:$0xff]   ;;  %v1174_v41 = vld [vmem:[#allocation8 + $0x8] sm:$0xff]  }
  0x65   :  { %509 = vmatprep.subr.bf16.mxu0 %v1078_v16  ;;  %v1152_v16 = vld [vmem:[#allocation5 + $0x1f0] ss:$8 sps:$4 sm:$0xff]  }
  0x66   :  { %998 = vmatpush3.bf16.msra.mxu1 %v1166_v43  ;;  %v1176_v43 = vld [vmem:[#allocation8 + $0x18] sm:$0xff]  }
  0x67   :  { %999 = vmatprep.subr.bf16.mxu1 %v1167_v46  ;;  %v1179_v46 = vld [vmem:[#allocation8 + $0x30] sm:$0xff]  }
  0x68   :  { %510 = vmatpush1.bf16.msra.mxu0 %v1080_v17  ;;  %v897_v17 = vcombine.low %v1406_v45, %v1406_v45  ;;  %v1178_v45 = vld [vmem:[#allocation8 + $0x28] sm:$0xff]  }
  0x69   :  { %511 = vmatprep.subr.bf16.mxu0 %v1081_v18  ;;  %v1169_v18 = vld [vmem:[#allocation7 + $0x70] sm:$0xff]  }
  0x6a   :  { %1000 = vmatpush3.bf16.msra.mxu1 %v1168_v51 }
  0x6b   :  { %1001 = vmatprep.subr.bf16.mxu1 %v1169_v18 }
  0x6c   :  { %512 = vmatpush1.bf16.msra.mxu0 %v1083_v19  ;;  %v1170_v19 = vld [vmem:[#allocation7 + $0x30] sm:$0xff]  }
  0x6d   :  { %513 = vmatprep.subr.bf16.mxu0 %v1084_v20  ;;  %v1171_v20 = vld [vmem:[#allocation7 + $0x78] sm:$0xff]  }
  0x6e   :  { %1002 = vmatpush3.bf16.msra.mxu1 %v1170_v19 }
  0x6f   :  { %1003 = vmatprep.subr.bf16.mxu1 %v1171_v20 }
  0x70   :  { %514 = vmatpush1.bf16.msra.mxu0 %v1086_v21  ;;  %v1172_v21 = vld [vmem:[#allocation7 + $0x38] sm:$0xff]  }
  0x71   :  { %515 = vmatprep.subr.bf16.mxu0 %v1087_v22  ;;  %v1311_v22 = vmov 0.0  }
  0x72   :  { %1004 = vmatpush3.bf16.msra.mxu1 %v1172_v21 }
  0x73   :  { %1020 = vmatprep.subr.bf16.mxu1 %v1311_v22 }
  0x74   :  { %516 = vmatpush1.bf16.msra.mxu0 %v1089_v23  ;;  %v151_v23 = vlaneseq }
  0x75   :  { %517 = vmatprep.subr.bf16.mxu0 %v1090_v24 }
  0x76   :  { %v152_v24 = vshrl.u32 %v151_v23, 7 }
  0x78   :  { %518 = vmatpush1.bf16.msra.mxu0 %v1092_v25  ;;  %v153_v25 = vsub.s32 0, %v152_v24  ;;  %v157_v27 = vsub.s32 1, %v152_v24 }
  0x79   :  { %519 = vmatprep.subr.bf16.mxu0 %v1093_v26  ;;  %v81_v26 = vld [vmem:[%s1437_s2] sm:$0x3] }
  0x7a   :  { %v158_v29 = vrot.slane %v81_v26, %v157_v27 }
  0x7c   :  { %520 = vmatpush1.bf16.msra.mxu0 %v1095_v28  ;;  %v154_v28 = vrot.slane %v81_v26, %v153_v25 }
  0x7d   :  { %521 = vmatprep.subr.bf16.mxu0 %v1096_v30 }
  0x80   :  { %522 = vmatpush1.bf16.msra.mxu0 %v1098_v34 }
  0x81   :  { %523 = vmatprep.subr.bf16.mxu0 %v1099_v35 }
  0x84   :  { %524 = vmatpush1.bf16.msra.mxu0 %v1101_v38 }
  0x85   :  { %525 = vmatprep.subr.bf16.mxu0 %v1102_v39  ;;  %v1173_v39 = vld [vmem:[#allocation8] sm:$0xff]  }
  0x88   :  { %526 = vmatpush1.bf16.msra.mxu0 %v1104_v42  ;;  %v1175_v42 = vld [vmem:[#allocation8 + $0x10] sm:$0xff]  }
  0x89   :  { %536 = vmatprep.subr.bf16.mxu0 %v1109_v44  ;;  %v1177_v44 = vld [vmem:[#allocation8 + $0x20] sm:$0xff]  }
  0x8b   :  { %528 = vmatmul.mubr.bf16.vlgmr.msra.gmra.mrb[0].mxu0 %v895_v47  ;;  %v1180_v47 = vld [vmem:[#allocation8 + $0x38] sm:$0xff]  }
  0x8c   :  { %537 = vmatpush1.bf16.msra.mxu0 %v1107_v48  ;;  %568 = vmatprep.mubr.bf16.mxu0 %v898_v49  ;;  %v963_v49 = vld [vmem:[%s1439_s4] ss:$0 sm:$0xff]  ;;  %s1313_s4 = smov [#allocation10]  }
  0x8d   :  { %538 = vmatprep.subr.bf16.mxu0 %v1112_v50  ;;  %s884_s30 = sshll.u32 %s1313_s4, 4  ;;  %s885_s30 = int_to_ptr.vmem [resolvable:$true] %s884_s30 }
  0x8e   :  { %p1278_p5 = scmp.lt.s32.totalorder %s885_s30, %s885_s30 }
  0x90   :  { %539 = vmatpush1.bf16.msra.mxu0 %v1110_v52 }
  0x91   :  { %540 = vmatprep.subr.bf16.mxu0 %v1115_v53 }
  0x94   :  { %541 = vmatpush1.bf16.msra.mxu0 %v1113_v54 }
  0x95   :  { %542 = vmatprep.subr.bf16.mxu0 %v1118_v55 }
  0x98   :  { %543 = vmatpush1.bf16.msra.mxu0 %v1116_v56 }
  0x99   :  { %544 = vmatprep.subr.bf16.mxu0 %v1121_v57  ;;  %v980_v57 = vld [vmem:[%s1441_s6] ss:$0 sm:$0xff]  ;;  %s1273_s6 = scalar_lea.vmem %s885_s30, 128 }
  0x9a   :  { %p1274_p4 = scmp.ne.s32.totalorder %s885_s30, %s1273_s6  ;;  %p1279_p6 = scmp.lt.s32.totalorder %s1273_s6, %s1273_s6 }
  0x9c   :  { %545 = vmatpush1.bf16.msra.mxu0 %v1119_v58  ;;  %p1280_p7 = por %p1279_p6, %p1278_p5 }
  0x9d   :  { %546 = vmatprep.subr.bf16.mxu0 %v1124_v59 }
  0x9e   :  { %p1281_p8 = pnand %p1280_p7, %p1274_p4 }
  0xa0   :  { %547 = vmatpush1.bf16.msra.mxu0 %v1122_v60 }
  0xa1   :  { %548 = vmatprep.subr.bf16.mxu0 %v1127_v61 }
  0xa4   :  { %549 = vmatpush1.bf16.msra.mxu0 %v1125_v62 }
  0xa5   :  { %550 = vmatprep.subr.bf16.mxu0 %v1130_v63 }
  0xa8   :  { %551 = vmatpush1.bf16.msra.mxu0 %v1128_v0 }
  0xa9   :  { %552 = vmatprep.subr.bf16.mxu0 %v1133_v1 }
  0xac   :  { %553 = vmatpush1.bf16.msra.mxu0 %v1131_v2 }
  0xad   :  { %554 = vmatprep.subr.bf16.mxu0 %v1136_v3 }
  0xb0   :  { %555 = vmatpush1.bf16.msra.mxu0 %v1134_v4 }
  0xb1   :  { %556 = vmatprep.subr.bf16.mxu0 %v1139_v5 }
  0xb4   :  { %557 = vmatpush1.bf16.msra.mxu0 %v1137_v6 }
  0xb5   :  { %558 = vmatprep.subr.bf16.mxu0 %v1142_v7 }
  0xb8   :  { %559 = vmatpush1.bf16.msra.mxu0 %v1140_v8 }
  0xb9   :  { %560 = vmatprep.subr.bf16.mxu0 %v1145_v9 }
  0xbc   :  { %561 = vmatpush1.bf16.msra.mxu0 %v1143_v10 }
  0xbd   :  { %562 = vmatprep.subr.bf16.mxu0 %v1148_v11 }
  0xc0   :  { %563 = vmatpush1.bf16.msra.mxu0 %v1146_v12 }
  0xc1   :  { %564 = vmatprep.subr.bf16.mxu0 %v1151_v13 }
  0xc4   :  { %565 = vmatpush1.bf16.msra.mxu0 %v1149_v14 }
  0xc5   :  { %566 = vmatprep.subr.bf16.mxu0 %v1154_v15 }
  0xc8   :  { %567 = vmatpush1.bf16.msra.mxu0 %v1152_v16 }
  0xcb   :  { %569 = vmatmul.mubr.bf16.vlgmr.msra.gmra.mrb[0].mxu0 %v897_v17 }
 0x19e   :  { %v570_v30 = vpop.f32.mrb[0].mxu0 }
 0x19f   :  { %v1040_v31 = vadd.f32 %v570_v30, %v154_v28  ;;  %v572_v32 = vpop.f32.mrb[1].mxu0 }
 0x1a0   :  { %v1041_v33 = vadd.f32 %v572_v32, %v158_v29  ;;  %v574_v34 = vpop.f32.mrb[2].mxu0 }
 0x1a1   :  { %v577_v35 = vmax.f32 %v1040_v31, 0.0  ;;  %v575_v36 = vpop.f32.mrb[3].mxu0 }
 0x1a2   :  { %v578_v37 = vmax.f32 %v1041_v33, 0.0 }
 0x1a3   :  { %v579_v40 = vpack.c.bf16 %v577_v35, %v577_v35 }
 0x1a4   :  { %v580_v38 = vpack.c.bf16 %v578_v37, %v578_v37 }
 0x1a6   :  { %747 = vmatprep.mubr.bf16.mxu1 %v580_v38 }
 0x1a7   :  { %748 = vmatmul.mubr.bf16.vlgmr.msra.gmra.mrb[0].mxu1 %v579_v40 }
 0x1a8   :  { %1021 = vmatpush3.bf16.msra.mxu1 %v1173_v39  ;;  %1036 = vmatprep.mubr.msk.bf16.mxu1 %vm1312_vm0, %v1311_v22 }
 0x1a9   :  { %1022 = vmatprep.subr.bf16.mxu1 %v1311_v22 }
 0x1ac   :  { %1023 = vmatpush3.bf16.msra.mxu1 %v1174_v41 }
 0x1ad   :  { %1024 = vmatprep.subr.bf16.mxu1 %v1311_v22 }
 0x1b0   :  { %1025 = vmatpush3.bf16.msra.mxu1 %v1175_v42 }
 0x1b1   :  { %1026 = vmatprep.subr.bf16.mxu1 %v1311_v22 }
 0x1b4   :  { %1027 = vmatpush3.bf16.msra.mxu1 %v1176_v43 }
 0x1b5   :  { %1028 = vmatprep.subr.bf16.mxu1 %v1311_v22 }
 0x1b8   :  { %1029 = vmatpush3.bf16.msra.mxu1 %v1177_v44 }
 0x1b9   :  { %1030 = vmatprep.subr.bf16.mxu1 %v1311_v22 }
 0x1bc   :  { %1031 = vmatpush3.bf16.msra.mxu1 %v1178_v45 }
 0x1bd   :  { %1032 = vmatprep.subr.bf16.mxu1 %v1311_v22 }
 0x1c0   :  { %1033 = vmatpush3.bf16.msra.mxu1 %v1179_v46 }
 0x1c1   :  { %1034 = vmatprep.subr.bf16.mxu1 %v1311_v22 }
 0x1c4   :  { %1035 = vmatpush3.bf16.msra.mxu1 %v1180_v47 }
 0x27a   :  { %v1005_v48 = vpop.f32.mrb[0].mxu1 }
 0x27b   :  { %v1006_v50 = vpop.f32.mrb[1].mxu1 }
 0x27c   :  { %v1007_v51 = vadd.f32 %v1006_v50, %v1005_v48  ;;  %v1008_v52 = vpop.f32.mrb[2].mxu1 }
 0x27d   :  { %v1009_v53 = vpop.f32.mrb[3].mxu1 }
 0x27e   :  { %v750_v54 = vadd.f32 %v1007_v51, %v963_v49 }
 0x280   :  { %v755_v55 = vmax.f32 %v750_v54, 0.0 }
 0x282   :  { %v756_v56 = vpack.c.bf16 %v755_v55, %v755_v55 }
 0x284   :  { %1037 = vmatmul.mubr.bf16.vlgmr.msra.gmra.mrb[4].mxu1 %v756_v56 }
 0x357   :  { %v861_v58 = vpop.f32.mrb[4].mxu1 }
 0x358   :  { %v862_v59 = vadd.f32 %v980_v57, %v861_v58  ;;  %v1038_v60 = vpop.f32.mrb[5].mxu1 }
 0x359   :  { %v864_v61 = vpop.f32.mrb[6].mxu1 }
 0x35a   :  { %867 = vmax.xlane.f32.xlu0 %v862_v59  ;;  %v1039_v62 = vpop.f32.mrb[7].mxu1 }
 0x3e7   :  { %v868_v63 = vpop.xlane.xlu0 %867 }
 0x3e8   :  { %v869_v0 = vsub.f32 %v862_v59, %v868_v63 }
 0x3ea   :  { %v870_v1 = vmul.f32 1.442695, %v869_v0 }
 0x3ec   :  { %1181 = vpow2.f32 %v870_v1 }
 0x3f6   :  { %v1182_v2 = vpop.eup %1181 }
 0x3f7   :  { %872 = vadd.xlane.f32.xlu0 %v1182_v2 }
 0x484   :  { %v873_v3 = vpop.xlane.xlu0 %872 }
 0x485   :  { %1183 = vlog2.f32 %v873_v3 }
 0x48f   :  { %v1184_v4 = vpop.eup %1183 }
 0x490   :  { %v875_v5 = vmul.f32 0.6931472, %v1184_v4 }
 0x492   :  { %v876_v6 = vsub.f32 %v869_v0, %v875_v5 }
 0x494   :  { %877 = vst [vmem:[#allocation10] sm:$0xff] %v876_v6 }
 0x495   :  { %1284 = shalt.err (!%p1281_p8)
}
 0x496   :  { %s1285_s10 = scalar_lea.hbm %s1442_s7, 128 }
 0x497   :  { %p1286_p9 = scmp.ne.s32.totalorder %s1442_s7, %s1285_s10  ;;  %p1289_p10 = scmp.lt.u32.totalorder %s1285_s10, %s1442_s7 }
 0x499   :  { %p1291_p11 = pnand %p1289_p10, %p1286_p9 }
 0x49b   :  { %1294 = shalt.err (!%p1291_p11)
}
 0x49c   :  { %887 = dma.vmem_to_hbm [thread:$0]  %s885_s30, 128, %s1442_s7, [#allocation4]  }
 0x49d   :  { %1301 = dma.done.wait [#allocation4], 128  }
 0x49e   :  { %1302 = vsyncadd [#allocation4], 4294967168 }
 0x49f   :  { %891 = vsyncpa [#allocation3], 1 }
 0x4a0   :  { %892 = vsyncpa [#allocation6], 1 }
 0x4a1   :  { %893 = vsyncpa [#allocation9], 1 }
 0x4a2   :  { %894 = vsyncpa [#allocation4], 1 }

</bundles_post_ra>
